<compile_context>
chip_gen: v7x
topology: tpu7x:2x2x1
jax: 0.10.0
libtpu: 0.0.40
codegen_flags: <defaults>
</compile_context>

<pallas_src>
import functools

import numpy as np
import jax
import jax.numpy as jnp
from jax import lax
from jax.experimental import pallas as pl
from jax.experimental.pallas import tpu as pltpu


def _ts_corr_kernel(x_ref, o_ref, *, d, stride, n, w):
    # x_ref: (1, n, T)  -- one batch, features on sublanes, time on lanes
    # o_ref: (1, h, w)  -- pairs on sublanes, windows on lanes (final layout)

    # 1) Per-window row normalization (two-pass centered formulation, f32).
    #    After this, corr(j, k) is just sum_t xn_j[t] * xn_k[t].
    xn = []
    for i in range(w):                      # w, d, stride are Python ints -> static slices
        start = i * stride
        xw = x_ref[0, :, start:start + d].astype(jnp.float32)          # (n, d)
        xc = xw - jnp.mean(xw, axis=1, keepdims=True)                  # centered
        inv = lax.rsqrt(jnp.sum(xc * xc, axis=1, keepdims=True))       # (n, 1), EUP
        xn.append(xc * inv)                                            # unit-norm rows

    # 2) Pairwise correlations in the PyTorch ordering
    #    (0,1),(0,2),...,(0,n-1),(1,2),...  Build the full (h, w) tile in registers
    #    and emit a single lane-dense store at the end.
    rows = []
    for j in range(n - 1):
        cols = [
            jnp.sum(xn[i][j:j + 1, :] * xn[i][j + 1:, :], axis=1, keepdims=True)  # (k, 1)
            for i in range(w)
        ]
        rows.append(jnp.concatenate(cols, axis=1))                     # (n-1-j, w)
    o_ref[0, :, :] = jnp.concatenate(rows, axis=0)                     # single (h, w) store


def ts_corr(X, d=10, stride=10):
    """Pallas implementation of the ts_corr forward pass. X: (B, n, T) -> (B, h, w)."""
    B, n, T = X.shape
    w = (T - d) // stride + 1
    h = n * (n - 1) // 2

    kernel = functools.partial(_ts_corr_kernel, d=d, stride=stride, n=n, w=w)
    return pl.pallas_call(
        kernel,
        out_shape=jax.ShapeDtypeStruct((B, h, w), jnp.float32),
        grid_spec=pltpu.PrefetchScalarGridSpec(
            num_scalar_prefetch=0,
            grid=(B,),
            in_specs=[pl.BlockSpec((1, n, T), lambda b: (b, 0, 0))],
            out_specs=pl.BlockSpec((1, h, w), lambda b: (b, 0, 0)),
        ),
        compiler_params=pltpu.CompilerParams(
            dimension_semantics=("parallel",)),
    )(X)


def ts_corr_ref(X, d=10, stride=10):
    """Pure-JAX reference mirroring the PyTorch forward semantics."""
    B, n, T = X.shape
    w = (T - d) // stride + 1
    iu, ju = np.triu_indices(n, k=1)
    cols = []
    for i in range(w):
        xw = X[:, :, i * stride:i * stride + d].astype(jnp.float32)   # (B, n, d)
        xc = xw - jnp.mean(xw, axis=-1, keepdims=True)
        cov = jnp.einsum('bjd,bkd->bjk', xc, xc)
        ss = jnp.sum(xc * xc, axis=-1)
        r = cov / jnp.sqrt(ss[:, :, None] * ss[:, None, :])
        cols.append(r[:, iu, ju])                                     # (B, h)
    return jnp.stack(cols, axis=-1)                                   # (B, h, w)


if __name__ == "__main__":
    key = jax.random.PRNGKey(0)
    B, n, T = 2, 4, 30          # small shapes consistent with the module (d=10, stride=10)
    d, stride = 10, 10
    X = jax.random.normal(key, (B, n, T), dtype=jnp.float32)

    Z = ts_corr(X, d=d, stride=stride)
    Z = jax.block_until_ready(Z)

    # shape check + numeric check against the pure-JAX reference
    w = (T - d) // stride + 1
    h = n * (n - 1) // 2
    assert Z.shape == (B, h, w), Z.shape
    Z_ref = ts_corr_ref(X, d=d, stride=stride)
    np.testing.assert_allclose(np.asarray(Z), np.asarray(Z_ref), rtol=2e-4, atol=1e-5)

    print("KERNEL_OK")
</pallas_src>

<mosaic_0001>
module attributes {stable_mosaic.version = 11 : i64} {
  func.func @_ts_corr_kernel(%arg0: i32, %arg1: memref<1x4x30xf32, #tpu.memory_space<vmem>>, %arg2: memref<1x6x3xf32, #tpu.memory_space<vmem>>) attributes {dimension_semantics = [#tpu.dimension_semantics<parallel>], iteration_bounds = array<i64: 2>, scalar_prefetch = 0 : i64, scratch_operands = 0 : i64, tpu.core_type = #tpu.core_type<tc>, window_params = [{transform_indices = @transform_0, window_bounds = array<i64: 1, 4, 30>}, {transform_indices = @transform_1, window_bounds = array<i64: 1, 6, 3>}]} {
    %c0 = arith.constant 0 : index
    %c0_0 = arith.constant 0 : index
    %c0_1 = arith.constant 0 : index
    %0 = vector.load %arg1[%c0, %c0_0, %c0_1] : memref<1x4x30xf32, #tpu.memory_space<vmem>>, vector<1x4x10xf32>
    %1 = vector.shape_cast %0 : vector<1x4x10xf32> to vector<4x10xf32>
    %cst = arith.constant dense<0.000000e+00> : vector<4xf32>
    %2 = vector.multi_reduction <add>, %1, %cst [1] : vector<4x10xf32> to vector<4xf32>
    %3 = vector.shape_cast %2 : vector<4xf32> to vector<4x1xf32>
    %cst_2 = arith.constant 1.000000e+01 : f32
    %4 = vector.broadcast %cst_2 : f32 to vector<4x1xf32>
    %5 = arith.divf %3, %4 : vector<4x1xf32>
    %6 = vector.broadcast %5 : vector<4x1xf32> to vector<4x10xf32>
    %7 = arith.subf %1, %6 : vector<4x10xf32>
    %8 = arith.mulf %7, %7 : vector<4x10xf32>
    %cst_3 = arith.constant dense<0.000000e+00> : vector<4xf32>
    %9 = vector.multi_reduction <add>, %8, %cst_3 [1] : vector<4x10xf32> to vector<4xf32>
    %10 = vector.shape_cast %9 : vector<4xf32> to vector<4x1xf32>
    %11 = math.rsqrt %10 : vector<4x1xf32>
    %12 = vector.broadcast %11 : vector<4x1xf32> to vector<4x10xf32>
    %13 = arith.mulf %7, %12 : vector<4x10xf32>
    %c0_4 = arith.constant 0 : index
    %c0_5 = arith.constant 0 : index
    %c10 = arith.constant 10 : index
    %14 = vector.load %arg1[%c0_4, %c0_5, %c10] : memref<1x4x30xf32, #tpu.memory_space<vmem>>, vector<1x4x10xf32>
    %15 = vector.shape_cast %14 : vector<1x4x10xf32> to vector<4x10xf32>
    %cst_6 = arith.constant dense<0.000000e+00> : vector<4xf32>
    %16 = vector.multi_reduction <add>, %15, %cst_6 [1] : vector<4x10xf32> to vector<4xf32>
    %17 = vector.shape_cast %16 : vector<4xf32> to vector<4x1xf32>
    %cst_7 = arith.constant 1.000000e+01 : f32
    %18 = vector.broadcast %cst_7 : f32 to vector<4x1xf32>
    %19 = arith.divf %17, %18 : vector<4x1xf32>
    %20 = vector.broadcast %19 : vector<4x1xf32> to vector<4x10xf32>
    %21 = arith.subf %15, %20 : vector<4x10xf32>
    %22 = arith.mulf %21, %21 : vector<4x10xf32>
    %cst_8 = arith.constant dense<0.000000e+00> : vector<4xf32>
    %23 = vector.multi_reduction <add>, %22, %cst_8 [1] : vector<4x10xf32> to vector<4xf32>
    %24 = vector.shape_cast %23 : vector<4xf32> to vector<4x1xf32>
    %25 = math.rsqrt %24 : vector<4x1xf32>
    %26 = vector.broadcast %25 : vector<4x1xf32> to vector<4x10xf32>
    %27 = arith.mulf %21, %26 : vector<4x10xf32>
    %c0_9 = arith.constant 0 : index
    %c0_10 = arith.constant 0 : index
    %c20 = arith.constant 20 : index
    %28 = vector.load %arg1[%c0_9, %c0_10, %c20] : memref<1x4x30xf32, #tpu.memory_space<vmem>>, vector<1x4x10xf32>
    %29 = vector.shape_cast %28 : vector<1x4x10xf32> to vector<4x10xf32>
    %cst_11 = arith.constant dense<0.000000e+00> : vector<4xf32>
    %30 = vector.multi_reduction <add>, %29, %cst_11 [1] : vector<4x10xf32> to vector<4xf32>
    %31 = vector.shape_cast %30 : vector<4xf32> to vector<4x1xf32>
    %cst_12 = arith.constant 1.000000e+01 : f32
    %32 = vector.broadcast %cst_12 : f32 to vector<4x1xf32>
    %33 = arith.divf %31, %32 : vector<4x1xf32>
    %34 = vector.broadcast %33 : vector<4x1xf32> to vector<4x10xf32>
    %35 = arith.subf %29, %34 : vector<4x10xf32>
    %36 = arith.mulf %35, %35 : vector<4x10xf32>
    %cst_13 = arith.constant dense<0.000000e+00> : vector<4xf32>
    %37 = vector.multi_reduction <add>, %36, %cst_13 [1] : vector<4x10xf32> to vector<4xf32>
    %38 = vector.shape_cast %37 : vector<4xf32> to vector<4x1xf32>
    %39 = math.rsqrt %38 : vector<4x1xf32>
    %40 = vector.broadcast %39 : vector<4x1xf32> to vector<4x10xf32>
    %41 = arith.mulf %35, %40 : vector<4x10xf32>
    %42 = vector.extract_strided_slice %13 {offsets = [0, 0], sizes = [1, 10], strides = [1, 1]} : vector<4x10xf32> to vector<1x10xf32>
    %43 = vector.extract_strided_slice %13 {offsets = [1, 0], sizes = [3, 10], strides = [1, 1]} : vector<4x10xf32> to vector<3x10xf32>
    %44 = vector.broadcast %42 : vector<1x10xf32> to vector<3x10xf32>
    %45 = arith.mulf %44, %43 : vector<3x10xf32>
    %cst_14 = arith.constant dense<0.000000e+00> : vector<3xf32>
    %46 = vector.multi_reduction <add>, %45, %cst_14 [1] : vector<3x10xf32> to vector<3xf32>
    %47 = vector.shape_cast %46 : vector<3xf32> to vector<3x1xf32>
    %48 = vector.extract_strided_slice %27 {offsets = [0, 0], sizes = [1, 10], strides = [1, 1]} : vector<4x10xf32> to vector<1x10xf32>
    %49 = vector.extract_strided_slice %27 {offsets = [1, 0], sizes = [3, 10], strides = [1, 1]} : vector<4x10xf32> to vector<3x10xf32>
    %50 = vector.broadcast %48 : vector<1x10xf32> to vector<3x10xf32>
    %51 = arith.mulf %50, %49 : vector<3x10xf32>
    %cst_15 = arith.constant dense<0.000000e+00> : vector<3xf32>
    %52 = vector.multi_reduction <add>, %51, %cst_15 [1] : vector<3x10xf32> to vector<3xf32>
    %53 = vector.shape_cast %52 : vector<3xf32> to vector<3x1xf32>
    %54 = vector.extract_strided_slice %41 {offsets = [0, 0], sizes = [1, 10], strides = [1, 1]} : vector<4x10xf32> to vector<1x10xf32>
    %55 = vector.extract_strided_slice %41 {offsets = [1, 0], sizes = [3, 10], strides = [1, 1]} : vector<4x10xf32> to vector<3x10xf32>
    %56 = vector.broadcast %54 : vector<1x10xf32> to vector<3x10xf32>
    %57 = arith.mulf %56, %55 : vector<3x10xf32>
    %cst_16 = arith.constant dense<0.000000e+00> : vector<3xf32>
    %58 = vector.multi_reduction <add>, %57, %cst_16 [1] : vector<3x10xf32> to vector<3xf32>
    %59 = vector.shape_cast %58 : vector<3xf32> to vector<3x1xf32>
    %60 = tpu.concatenate %47, %53, %59 in 1 : vector<3x1xf32>, vector<3x1xf32>, vector<3x1xf32> -> vector<3x3xf32>
    %61 = vector.extract_strided_slice %13 {offsets = [1, 0], sizes = [1, 10], strides = [1, 1]} : vector<4x10xf32> to vector<1x10xf32>
    %62 = vector.extract_strided_slice %13 {offsets = [2, 0], sizes = [2, 10], strides = [1, 1]} : vector<4x10xf32> to vector<2x10xf32>
    %63 = vector.broadcast %61 : vector<1x10xf32> to vector<2x10xf32>
    %64 = arith.mulf %63, %62 : vector<2x10xf32>
    %cst_17 = arith.constant dense<0.000000e+00> : vector<2xf32>
    %65 = vector.multi_reduction <add>, %64, %cst_17 [1] : vector<2x10xf32> to vector<2xf32>
    %66 = vector.shape_cast %65 : vector<2xf32> to vector<2x1xf32>
    %67 = vector.extract_strided_slice %27 {offsets = [1, 0], sizes = [1, 10], strides = [1, 1]} : vector<4x10xf32> to vector<1x10xf32>
    %68 = vector.extract_strided_slice %27 {offsets = [2, 0], sizes = [2, 10], strides = [1, 1]} : vector<4x10xf32> to vector<2x10xf32>
    %69 = vector.broadcast %67 : vector<1x10xf32> to vector<2x10xf32>
    %70 = arith.mulf %69, %68 : vector<2x10xf32>
    %cst_18 = arith.constant dense<0.000000e+00> : vector<2xf32>
    %71 = vector.multi_reduction <add>, %70, %cst_18 [1] : vector<2x10xf32> to vector<2xf32>
    %72 = vector.shape_cast %71 : vector<2xf32> to vector<2x1xf32>
    %73 = vector.extract_strided_slice %41 {offsets = [1, 0], sizes = [1, 10], strides = [1, 1]} : vector<4x10xf32> to vector<1x10xf32>
    %74 = vector.extract_strided_slice %41 {offsets = [2, 0], sizes = [2, 10], strides = [1, 1]} : vector<4x10xf32> to vector<2x10xf32>
    %75 = vector.broadcast %73 : vector<1x10xf32> to vector<2x10xf32>
    %76 = arith.mulf %75, %74 : vector<2x10xf32>
    %cst_19 = arith.constant dense<0.000000e+00> : vector<2xf32>
    %77 = vector.multi_reduction <add>, %76, %cst_19 [1] : vector<2x10xf32> to vector<2xf32>
    %78 = vector.shape_cast %77 : vector<2xf32> to vector<2x1xf32>
    %79 = tpu.concatenate %66, %72, %78 in 1 : vector<2x1xf32>, vector<2x1xf32>, vector<2x1xf32> -> vector<2x3xf32>
    %80 = vector.extract_strided_slice %13 {offsets = [2, 0], sizes = [1, 10], strides = [1, 1]} : vector<4x10xf32> to vector<1x10xf32>
    %81 = vector.extract_strided_slice %13 {offsets = [3, 0], sizes = [1, 10], strides = [1, 1]} : vector<4x10xf32> to vector<1x10xf32>
    %82 = arith.mulf %80, %81 : vector<1x10xf32>
    %cst_20 = arith.constant dense<0.000000e+00> : vector<1xf32>
    %83 = vector.multi_reduction <add>, %82, %cst_20 [1] : vector<1x10xf32> to vector<1xf32>
    %84 = vector.shape_cast %83 : vector<1xf32> to vector<1x1xf32>
    %85 = vector.extract_strided_slice %27 {offsets = [2, 0], sizes = [1, 10], strides = [1, 1]} : vector<4x10xf32> to vector<1x10xf32>
    %86 = vector.extract_strided_slice %27 {offsets = [3, 0], sizes = [1, 10], strides = [1, 1]} : vector<4x10xf32> to vector<1x10xf32>
    %87 = arith.mulf %85, %86 : vector<1x10xf32>
    %cst_21 = arith.constant dense<0.000000e+00> : vector<1xf32>
    %88 = vector.multi_reduction <add>, %87, %cst_21 [1] : vector<1x10xf32> to vector<1xf32>
    %89 = vector.shape_cast %88 : vector<1xf32> to vector<1x1xf32>
    %90 = vector.extract_strided_slice %41 {offsets = [2, 0], sizes = [1, 10], strides = [1, 1]} : vector<4x10xf32> to vector<1x10xf32>
    %91 = vector.extract_strided_slice %41 {offsets = [3, 0], sizes = [1, 10], strides = [1, 1]} : vector<4x10xf32> to vector<1x10xf32>
    %92 = arith.mulf %90, %91 : vector<1x10xf32>
    %cst_22 = arith.constant dense<0.000000e+00> : vector<1xf32>
    %93 = vector.multi_reduction <add>, %92, %cst_22 [1] : vector<1x10xf32> to vector<1xf32>
    %94 = vector.shape_cast %93 : vector<1xf32> to vector<1x1xf32>
    %95 = tpu.concatenate %84, %89, %94 in 1 : vector<1x1xf32>, vector<1x1xf32>, vector<1x1xf32> -> vector<1x3xf32>
    %96 = tpu.concatenate %60, %79, %95 in 0 : vector<3x3xf32>, vector<2x3xf32>, vector<1x3xf32> -> vector<6x3xf32>
    %c0_23 = arith.constant 0 : index
    %c0_24 = arith.constant 0 : index
    %c0_25 = arith.constant 0 : index
    %97 = vector.load %arg2[%c0_23, %c0_24, %c0_25] : memref<1x6x3xf32, #tpu.memory_space<vmem>>, vector<1x6x3xf32>
    %98 = vector.shape_cast %97 : vector<1x6x3xf32> to vector<6x3xf32>
    %99 = vector.shape_cast %96 : vector<6x3xf32> to vector<1x6x3xf32>
    tpu.vector_store %arg2[%c0_23, %c0_24, %c0_25], %99 {strides = array<i32>} : memref<1x6x3xf32, #tpu.memory_space<vmem>>, vector<1x6x3xf32>,
    return
  }
  func.func @transform_0(%arg0: i32) -> (i32, i32, i32) {
    %c0_i32 = arith.constant 0 : i32
    %c0_i32_0 = arith.constant 0 : i32
    %c0_i32_1 = arith.constant 0 : i32
    return %arg0, %c0_i32, %c0_i32_0 : i32, i32, i32
  }
  func.func @transform_1(%arg0: i32) -> (i32, i32, i32) {
    %c0_i32 = arith.constant 0 : i32
    %c0_i32_0 = arith.constant 0 : i32
    %c0_i32_1 = arith.constant 0 : i32
    return %arg0, %c0_i32, %c0_i32_0 : i32, i32, i32
  }
}

</mosaic_0001>

<bundles_post_ra>
// kernel: tpu_custom_call.1
= control target key start
LH: loop header
LB: loop body
LE: loop exit
PB: predicated region body
PF: predicated region fallthrough
CT: control target
= control target key end

     0   :  { %6 = vsyncpa [#allocation3], 0  ;;  %s632_s0 = inlined_call_operand.hbm [shape: f32[2,4,30], index: 0, kind: input, shape index: {}]   ;;  %s633_s1 = inlined_call_operand.vmem [shape: f32[2,6,3], index: 1, kind: output, shape index: {}]  }
   0x1   :  { %8 = vsyncpa [#allocation3 + $0x1], 0  ;;  %s503_s6 = smov 0   ;;  %s505_s7 = smov 0  }
   0x2   :  { %s507_s8 = smov 0   ;;  %s509_s9 = smov 0  }
   0x3 LB: > { %s522_s10 = sadd.s32 4294967295, %s488_s9   ;;  %s525_s11 = sadd.s32 1, %s488_s9   ;;  %s488_s9 = sphi %s509_s9, %s641_s9   ;;  %s484_s8 = sphi %s507_s8, %s640_s8   ;;  %s480_s7 = sphi %s505_s7, %s639_s7   ;;  %s476_s6 = sphi %s503_s6, %s638_s6  }
   0x4   : > { %s18_s12 = ssub.s32 %s488_s9, %s525_s11  ;;  %s21_s13 = sadd.s32 1, %s484_s8 }
   0x5   : > { %p19_p0 = scmp.eq.s32.totalorder %s18_s12, 0  ;;  %p28_p1 = scmp.ne.s32.totalorder %s484_s8, %s480_s7 }
   0x6   : > { %p29_p2 = scmp.eq.s32.totalorder %s488_s9, 0  ;;  %p34_p3 = scmp.ne.s32.totalorder %s480_s7, %s476_s6 }
   0x7   : > { %s535_s14 = scalar_select %p19_p0, %s484_s8, %s21_s13  }
   0x8   : > { %p30_p4 = por %p29_p2, %p28_p1  ;;  %p35_p5 = scmp.eq.s32.totalorder %s522_s10, 0 }
   0x9   : > { %p383_p6 = scmp.lt.s32.totalorder %s488_s9, 2  ;;  %s84_s16 = sand.u32 1, %s484_s8  }
   0xa   : > { %p539_p7 = por %p35_p5, %p34_p3  ;;  %s370_s17 = sshll.u32 %s84_s16, 2 }
   0xb   : > { %s371_s18 = sshll.u32 %s488_s9, 6  ;;  %s88_s22 = scalar_lea.vmem [#allocation2], %s370_s17 }
   0xc   : > { %s548_s21 = scalar_lea.hbm %s632_s0, %s371_s18  ;;  %s95_s23 = sshll.u32 %s88_s22, 4  ;;  %s550_s23 = int_to_ptr.vmem [resolvable:$true] %s95_s23 }
   0xd   : > { %p552_p8 = pnand %p383_p6, %p30_p4  ;;  %s85_s25 = scalar_lea.sflag [#allocation3], %s84_s16 }
   0xe   : > { %s424_s26 = scalar_lea.hbm %s548_s21, 64  ;;  %s429_s29 = scalar_lea.hbm %s632_s0, 128 }
   0xf   : > { %p425_p11 = scmp.ne.s32.totalorder %s548_s21, %s424_s26  ;;  %p426_p12 = pneg %p552_p8 }
  0x10   : > { %p430_p1 = scmp.lt.u32.totalorder %s548_s21, %s632_s0  ;;  %p431_p2 = scmp.lt.u32.totalorder %s429_s29, %s424_s26 }
  0x11   : > { %p427_p13 = pnand %p426_p12, %p425_p11  ;;  %p433_p4 = scmp.lt.u32.totalorder %s424_s26, %s548_s21 }
  0x12   : > { %p432_p3 = por %p431_p2, %p430_p1 }
  0x13   : > { %p428_p0 = pneg %p427_p13 }
  0x14   : > { %p434_p5 = por %p433_p4, %p432_p3 }
  0x16   : > { %p435_p6 = pnand %p434_p5, %p428_p0 }
  0x18   : > { %438 = shalt.err (!%p435_p6)
}
  0x19   : > { %s439_s3 = scalar_lea.vmem %s550_s23, 64  ;;  %s490_s4 = smov [#allocation2]  }
  0x1a   : > { %p440_p11 = scmp.ne.s32.totalorder %s550_s23, %s439_s3  ;;  %s444_s5 = sshll.u32 %s490_s4, 4  ;;  %s445_s5 = int_to_ptr.vmem [resolvable:$false] %s444_s5 }
  0x1b   : > { %s446_s6 = scalar_lea.vmem %s445_s5, 128  ;;  %p447_p10 = scmp.lt.s32.totalorder %s550_s23, %s445_s5 }
  0x1c   : > { %p442_p13 = pnand %p440_p11, %p426_p12  ;;  %p448_p1 = scmp.lt.s32.totalorder %s446_s6, %s439_s3 }
  0x1e   : > { %p443_p9 = pneg %p442_p13  ;;  %p449_p2 = por %p448_p1, %p447_p10 }
  0x20   : > { %p450_p3 = pnand %p449_p2, %p443_p9 }
  0x22   : > { %453 = shalt.err (!%p450_p3)
}
  0x23   : > { %382 = dma.hbm_to_vmem [thread:$0]  (!%p552_p8), %s548_s21, 64, %s550_s23, %s85_s25  }
  0x24   : > { %p636_p0 = scmp.lt.s32.totalorder %s488_s9, 3  ;;  %p637_p4 = scmp.ge.s32.totalorder %s488_s9, 1 }
  0x26   : > { %p101_p12 = pnand %p637_p4, %p636_p0 }
  0x27   : > { %s106_s12 = sand.u32 (!%p101_p12), 1, %s480_s7  }
  0x28   : > { %104 = sbr.rel (%p101_p12) target bundleno = 959 (0x3bf), region = 24  ;;  %s373_s13 = sshll.u32 (!%p101_p12), %s106_s12, 2 }
  0x29   : > { %s107_s16 = scalar_lea.sflag (!%p101_p12), [#allocation3], %s106_s12  ;;  %s110_s17 = scalar_lea.vmem (!%p101_p12), [#allocation2], %s373_s13 }
  0x2f   : > { %471 = dma.done.wait (%p539_p7), %s107_s16, 64  }
  0x30   : > { %473 = vsyncadd (%p539_p7), %s107_s16, 4294967232  ;;  %v132_v0 = vld [vmem:[%s110_s17] sm:$0xf]  ;;  %s491_s18 = smov 118   ;;  %s492_s19 = smov 108   ;;  %vm133_vm0 = vcmask 76800   ;;  %v183_v25 = vlaneseq }
  0x31   : > { %147 = vrot.lane.b32.xlu0 %v132_v0, %s491_s18  ;;  %v134_v13 = vsel %vm133_vm0, %v132_v0, 0.0  ;;  %vm225_vm1 = vcmask 76802   ;;  %vm188_vm2 = vcmask 76801   ;;  %vm259_vm3 = vcmask 75778   ;;  %p128_p7 = scmp.lt.s32.totalorder %s522_s10, 1 }
  0x32   : > { %v184_v26 = vshrl.u32 %v183_v25, 7  ;;  %vm216_vm4 = vcmask 7168   ;;  %vm218_vm5 = vcmask 15360   ;;  %vm296_vm6 = vcmask 1042432  }
  0x33   : > { %s643_s10 = smov (!%p128_p7, %s522_s10), 1  ;;  %vm298_vm7 = vcmask 1044480   ;;  %vm300_vm8 = vcmask 21504  }
  0x34   : > { %v222_v30 = vsub.s32 1, %v184_v26  ;;  %v185_v31 = vsub.s32 0, %v184_v26  ;;  %s374_s9 = sshll.u32 %s643_s10, 3 }
  0x35   : > { %165 = vrot.lane.b32.xlu0 %v132_v0, %s492_s19  ;;  %s131_s21 = scalar_lea.vmem %s633_s1, %s374_s9 }
  0xa3   : > { %v148_v1 = vpop.permute.xlu0 %147 }
  0xa4   : > { %v150_v2 = vsel %vm133_vm0, %v148_v1, 0.0 }
  0xa5   : > { %151 = vadd.xlane.f32.xlu1 %v150_v2 }
  0xa7   : > { %v166_v3 = vpop.permute.xlu0 %165 }
  0xa8   : > { %v168_v4 = vsel %vm133_vm0, %v166_v3, 0.0 }
  0xa9   : > { %169 = vadd.xlane.f32.xlu1 %v168_v4 }
 0x132   : > { %v152_v5 = vpop.xlane.xlu1 %151 }
 0x133   : > { %v153_v6 = vmul.f32 0.1, %v152_v5 }
 0x135   : > { %v154_v7 = vsub.f32 %v132_v0, %v153_v6 }
 0x136   : > { %v170_v8 = vpop.xlane.xlu1 %169 }
 0x137   : > { %v171_v9 = vmul.f32 0.1, %v170_v8  ;;  %v155_v10 = vmul.f32 %v154_v7, %v154_v7 }
 0x139   : > { %v172_v11 = vsub.f32 %v132_v0, %v171_v9  ;;  %157 = vrot.lane.b32.xlu0 %v155_v10, %s491_s18 }
 0x13b   : > { %v173_v12 = vmul.f32 %v172_v11, %v172_v11 }
 0x13d   : > { %175 = vrot.lane.b32.xlu1 %v173_v12, %s492_s19 }
 0x158   : > { %135 = vadd.xlane.f32.xlu0 %v134_v13 }
 0x1ab   : > { %v158_v14 = vpop.permute.xlu0 %157 }
 0x1ac   : > { %v160_v15 = vsel %vm133_vm0, %v158_v14, 0.0 }
 0x1ad   : > { %161 = vadd.xlane.f32.xlu0 %v160_v15 }
 0x1af   : > { %v176_v16 = vpop.permute.xlu1 %175 }
 0x1b0   : > { %v178_v17 = vsel %vm133_vm0, %v176_v16, 0.0 }
 0x1b1   : > { %179 = vadd.xlane.f32.xlu0 %v178_v17 }
 0x1e5   : > { %v136_v18 = vpop.xlane.xlu0 %135 }
 0x1e6   : > { %v138_v19 = vmul.f32 0.1, %v136_v18 }
 0x1e8   : > { %v139_v20 = vsub.f32 %v132_v0, %v138_v19 }
 0x1ea   : > { %v140_v21 = vmul.f32 %v139_v20, %v139_v20 }
 0x1ec   : > { %v141_v22 = vsel %vm133_vm0, %v140_v21, 0.0 }
 0x1ed   : > { %142 = vadd.xlane.f32.xlu1 %v141_v22 }
 0x23a   : > { %v162_v24 = vpop.xlane.xlu0 %161 }
 0x23e   : > { %v180_v27 = vpop.xlane.xlu0 %179 }
 0x27a   : > { %v143_v23 = vpop.xlane.xlu1 %142 }
 0x27b   : > { %418 = vrsqrt.f32 %v143_v23 }
 0x27c   : > { %420 = vrsqrt.f32 %v180_v27 }
 0x27d   : > { %422 = vrsqrt.f32 %v162_v24 }
 0x285   : > { %v419_v28 = vpop.eup %418 }
 0x286   : > { %v145_v29 = vmul.f32 %v419_v28, %v139_v20  ;;  %v421_v38 = vpop.eup %420 }
 0x287   : > { %v182_v39 = vmul.f32 %v421_v38, %v172_v11  ;;  %v423_v40 = vpop.eup %422 }
 0x288   : > { %v223_v32 = vrot.slane %v145_v29, %v222_v30  ;;  %v186_v33 = vrot.slane %v145_v29, %v185_v31  ;;  %v164_v42 = vmul.f32 %v423_v40, %v154_v7  ;;  %v256_v60 = vrot.slane %v145_v29, 1 }
 0x289   : > { %v207_v41 = vrot.slane %v182_v39, %v185_v31  ;;  %v244_v44 = vrot.slane %v182_v39, %v222_v30  ;;  %v275_v52 = vrot.slane %v182_v39, 1 }
 0x28a   : > { %v224_v34 = vmul.f32 %v223_v32, %v145_v29  ;;  %v187_v35 = vmul.f32 %v186_v33, %v145_v29  ;;  %v195_v45 = vrot.slane %v164_v42, %v185_v31  ;;  %v232_v48 = vrot.slane %v164_v42, %v222_v30 }
 0x28b   : > { %v208_v43 = vmul.f32 %v207_v41, %v182_v39  ;;  %v245_v46 = vmul.f32 %v244_v44, %v182_v39  ;;  %v264_v50 = vrot.slane %v164_v42, 1  ;;  %v277_v53 = vmul.f32 %v275_v52, %v182_v39 }
 0x28c   : > { %v226_v36 = vsel %vm225_vm1, %v224_v34, 0.0  ;;  %v189_v37 = vsel %vm188_vm2, %v187_v35, 0.0  ;;  %v196_v47 = vmul.f32 %v195_v45, %v164_v42  ;;  %v233_v49 = vmul.f32 %v232_v48, %v164_v42 }
 0x28d   : > { %227 = vadd.xlane.f32.xlu1 %v226_v36  ;;  %190 = vadd.xlane.f32.xlu0 %v189_v37  ;;  %v266_v51 = vmul.f32 %v264_v50, %v164_v42  ;;  %v258_v1 = vmul.f32 %v256_v60, %v145_v29 }
 0x28f   : > { %v260_v3 = vsel %vm259_vm3, %v258_v1, 0.0 }
 0x29e   : > { %210 = vrot.lane.b32.xlu1 %v208_v43, %s492_s19 }
 0x2a2   : > { %247 = vrot.lane.b32.xlu1 %v245_v46, %s492_s19 }
 0x2a3   : > { %198 = vrot.lane.b32.xlu0 %v196_v47, %s491_s18 }
 0x2a7   : > { %235 = vrot.lane.b32.xlu0 %v233_v49, %s491_s18 }
 0x2ab   : > { %268 = vrot.lane.b32.xlu0 %v266_v51, %s491_s18 }
 0x2af   : > { %279 = vrot.lane.b32.xlu0 %v277_v53, %s492_s19 }
 0x31a   : > { %v228_v54 = vpop.xlane.xlu1 %227  ;;  %v191_v55 = vpop.xlane.xlu0 %190 }
 0x31e   : > { %v211_v56 = vpop.permute.xlu1 %210  ;;  %v199_v57 = vpop.permute.xlu0 %198 }
 0x31f   : > { %v213_v58 = vsel %vm188_vm2, %v211_v56, 0.0  ;;  %v201_v59 = vsel %vm188_vm2, %v199_v57, 0.0 }
 0x320   : > { %214 = vadd.xlane.f32.xlu0 %v213_v58  ;;  %202 = vadd.xlane.f32.xlu1 %v201_v59 }
 0x322   : > { %v248_v61 = vpop.permute.xlu1 %247  ;;  %v236_v62 = vpop.permute.xlu0 %235 }
 0x323   : > { %v250_v63 = vsel %vm225_vm1, %v248_v61, 0.0  ;;  %v238_v0 = vsel %vm225_vm1, %v236_v62, 0.0 }
 0x324   : > { %251 = vadd.xlane.f32.xlu0 %v250_v63  ;;  %239 = vadd.xlane.f32.xlu1 %v238_v0 }
 0x326   : > { %v269_v2 = vpop.permute.xlu0 %268 }
 0x327   : > { %v271_v4 = vsel %vm259_vm3, %v269_v2, 0.0 }
 0x328   : > { %261 = vadd.xlane.f32.xlu1 %v260_v3  ;;  %272 = vadd.xlane.f32.xlu0 %v271_v4 }
 0x32a   : > { %v280_v5 = vpop.permute.xlu0 %279 }
 0x32b   : > { %v282_v6 = vsel %vm259_vm3, %v280_v5, 0.0 }
 0x32c   : > { %283 = vadd.xlane.f32.xlu0 %v282_v6 }
 0x3ad   : > { %v203_v7 = vpop.xlane.xlu1 %202  ;;  %v215_v8 = vpop.xlane.xlu0 %214 }
 0x3ae   : > { %v217_v12 = vsel %vm216_vm4, %v191_v55, %v203_v7 }
 0x3af   : > { %v219_v16 = vsel %vm218_vm5, %v217_v12, %v215_v8 }
 0x3b0   : > { %v288_v20 = vrot.slane %v219_v16, 1 }
 0x3b1   : > { %v240_v9 = vpop.xlane.xlu1 %239  ;;  %v252_v10 = vpop.xlane.xlu0 %251 }
 0x3b2   : > { %v253_v11 = vsel %vm216_vm4, %v228_v54, %v240_v9 }
 0x3b3   : > { %v254_v13 = vsel %vm218_vm5, %v253_v11, %v252_v10 }
 0x3b4   : > { %v291_v17 = vrot.slane %v254_v13, 7 }
 0x3b5   : > { %v273_v14 = vpop.xlane.xlu0 %272  ;;  %v262_v15 = vpop.xlane.xlu1 %261 }
 0x3b6   : > { %v285_v18 = vsel %vm216_vm4, %v262_v15, %v273_v14  ;;  %v297_v23 = vsel %vm296_vm6, %v288_v20, %v291_v17 }
 0x3b9   : > { %v284_v19 = vpop.xlane.xlu0 %283 }
 0x3ba   : > { %v286_v21 = vsel %vm218_vm5, %v285_v18, %v284_v19 }
 0x3bb   : > { %v294_v22 = vrot.slane %v286_v21, 5 }
 0x3bd   : > { %v299_v24 = vsel %vm298_vm7, %v297_v23, %v294_v22 }
 0x3be   : > { %301 = vst.msk [vmem:[%s131_s21] sm:$0x3f] %vm300_vm8, %v299_v24 }
 0x3bf PF: > { %p11_p8 = scmp.ge.s32.totalorder %s525_s11, 4   ;;  %s638_s6 = smov %s480_s7 }
 0x3c0   : > { %s639_s7 = smov %s484_s8  ;;  %s640_s8 = smov %s535_s14 }
 0x3c1   : > { %s641_s9 = smov %s525_s11  ;;  %13 = sbr.rel (!%p11_p8) target bundleno = 3 (0x3), region = 64 }
 0x3c8   :  { %321 = vsyncpa [#allocation3], 1 }
 0x3c9   :  { %323 = vsyncpa [#allocation3 + $0x1], 1 }

</bundles_post_ra>
